<compile_context>
chip_gen: v6e
topology: v6e:2x2x1
jax: 0.10.0
libtpu: 0.0.40
codegen_flags: <defaults>
</compile_context>

<pallas_src>
import jax
import jax.numpy as jnp
from jax.experimental import pallas as pl
from jax.experimental.pallas import tpu as pltpu


def _round_up(x: int, m: int) -> int:
    return (x + m - 1) // m * m


def _pick_tile(n: int, f: int, in_itemsize: int) -> int:
    """Largest MXU/lane-aligned square output tile whose double-buffered
    working set stays comfortably inside scoped VMEM on v5e/v6e/v7x."""
    budget = 24 * 1024 * 1024  # headroom under 32 MiB scoped / 64 MiB v7x physical
    tile = 512
    while tile > 128:
        # 2 input tiles (row + col) and 1 output tile, each double-buffered.
        need = 2 * (2 * tile * f * in_itemsize) + 2 * (tile * tile * 4)
        if need <= budget:
            break
        tile //= 2
    return min(tile, _round_up(n, 128))


def _gaussian_tile_kernel(scale_ref, xr_ref, xc_ref, rn_ref, cn_ref, o_ref):
    """One (TM, TN) output tile of K(X)."""
    # Cross term on the MXU: (TM, F) . (TN, F)^T -> (TM, TN), f32 accumulate.
    cross = jax.lax.dot_general(
        xr_ref[...], xc_ref[...],
        dimension_numbers=(((1,), (1,)), ((), ())),
        preferred_element_type=jnp.float32,
    )
    # d2 = ||x_i||^2 + ||x_j||^2 - 2 x_i.x_j, clamped (cancellation can go
    # slightly negative; the diagonal should be ~0).
    d2 = jnp.maximum(rn_ref[...] + cn_ref[...] - 2.0 * cross, 0.0)
    # scale = -1 / (2 sigma^2) precomputed once; one VPU mul feeding EUP exp.
    o_ref[...] = jnp.exp(d2 * scale_ref[0, 0]).astype(o_ref.dtype)


def gaussian_kernel(x, *, sigma=None, track_running_stats=True, alpha=1.0):
    """Pallas equivalent of GaussianKernel.forward. x: (N, F) array -> (N, N) f32."""
    assert track_running_stats or sigma is not None
    if not track_running_stats:
        assert float(sigma) != 0.0, "sigma must be nonzero when not tracking stats"

    N, F = x.shape
    x32 = x.astype(jnp.float32)

    # --- O(N*F) prologue: row squared norms + analytic sigma^2 -------------
    row_sq = jnp.sum(x32 * x32, axis=1)  # (N,)  ||x_i||^2
    if track_running_stats:
        # mean_{i,j} ||x_i - x_j||^2 == 2*mean_i ||x_i||^2 - 2*||mean_i x_i||^2
        mean_vec = jnp.mean(x32, axis=0)
        mean_d2 = 2.0 * jnp.mean(row_sq) - 2.0 * jnp.sum(mean_vec * mean_vec)
        sig_sq = jnp.float32(alpha) * mean_d2
    else:
        sig_sq = jnp.float32(float(sigma) ** 2)
    scale = jnp.asarray(-0.5 / sig_sq, dtype=jnp.float32).reshape(1, 1)

    # --- tiling / lane-dense padding ---------------------------------------
    tile = _pick_tile(N, F, jnp.dtype(x.dtype).itemsize)
    n_pad = _round_up(N, tile)
    pad = n_pad - N

    x_p = jnp.pad(x, ((0, pad), (0, 0)))                    # keep input dtype for MXU
    sq_p = jnp.pad(row_sq, (0, pad))
    rn = sq_p.reshape(n_pad, 1)                             # row-tile norms   (N_pad, 1)
    cn = sq_p.reshape(1, n_pad)                             # col-tile norms   (1, N_pad)

    grid = (n_pad // tile, n_pad // tile)

    out = pl.pallas_call(
        _gaussian_tile_kernel,
        grid=grid,
        in_specs=[
            pl.BlockSpec(memory_space=pltpu.MemorySpace.SMEM),      # scale (1,1)
            pl.BlockSpec((tile, F), lambda i, j: (i, 0)),           # row tile of X
            pl.BlockSpec((tile, F), lambda i, j: (j, 0)),           # col tile of X
            pl.BlockSpec((tile, 1), lambda i, j: (i, 0)),           # ||x_i||^2
            pl.BlockSpec((1, tile), lambda i, j: (0, j)),           # ||x_j||^2
        ],
        out_specs=pl.BlockSpec((tile, tile), lambda i, j: (i, j)),
        out_shape=jax.ShapeDtypeStruct((n_pad, n_pad), jnp.float32),
        compiler_params=pltpu.CompilerParams(
            dimension_semantics=("parallel", "parallel"),
            vmem_limit_bytes=48 * 1024 * 1024,
        ),
    )(scale, x_p, x_p, rn, cn)

    return out[:N, :N]


def _reference(x, *, sigma=None, track_running_stats=True, alpha=1.0):
    x = x.astype(jnp.float32)
    d2 = jnp.sum((x[None, :, :] - x[:, None, :]) ** 2, axis=2)
    if track_running_stats:
        sig_sq = alpha * jnp.mean(d2)
    else:
        sig_sq = jnp.float32(sigma) ** 2
    return jnp.exp(-d2 / (2.0 * sig_sq))


if __name__ == "__main__":
    key = jax.random.PRNGKey(0)
    N, F = 8, 128                      # minibatch=8, feature dim=128
    x = jax.random.normal(key, (N, F), dtype=jnp.float32)

    # running-stats path (default module behavior)
    out = jax.block_until_ready(gaussian_kernel(x, track_running_stats=True, alpha=1.0))
    ref = _reference(x, track_running_stats=True, alpha=1.0)
    assert out.shape == (N, N)
    assert jnp.allclose(out, ref, atol=1e-4, rtol=1e-4), "mismatch vs reference (running stats)"

    # fixed-sigma path
    out2 = jax.block_until_ready(gaussian_kernel(x, sigma=2.0, track_running_stats=False))
    ref2 = _reference(x, sigma=2.0, track_running_stats=False)
    assert jnp.allclose(out2, ref2, atol=1e-4, rtol=1e-4), "mismatch vs reference (fixed sigma)"

    print("KERNEL_OK")
</pallas_src>

<mosaic_0001>
module attributes {stable_mosaic.version = 11 : i64} {
  func.func @_gaussian_tile_kernel(%arg0: i32, %arg1: i32, %arg2: memref<1x1xf32, #tpu.memory_space<smem>>, %arg3: memref<128x128xf32, #tpu.memory_space<vmem>>, %arg4: memref<128x128xf32, #tpu.memory_space<vmem>>, %arg5: memref<128x1xf32, #tpu.memory_space<vmem>>, %arg6: memref<1x128xf32, #tpu.memory_space<vmem>>, %arg7: memref<128x128xf32, #tpu.memory_space<vmem>>) attributes {dimension_semantics = [#tpu.dimension_semantics<parallel>, #tpu.dimension_semantics<parallel>], iteration_bounds = array<i64: 1, 1>, scalar_prefetch = 0 : i64, scratch_operands = 0 : i64, tpu.core_type = #tpu.core_type<tc>, window_params = [{transform_indices = @transform_0, window_bounds = array<i64: 1, 1>}, {transform_indices = @transform_1, window_bounds = array<i64: 128, 128>}, {transform_indices = @transform_2, window_bounds = array<i64: 128, 128>}, {transform_indices = @transform_3, window_bounds = array<i64: 128, 1>}, {transform_indices = @transform_4, window_bounds = array<i64: 1, 128>}, {transform_indices = @transform_5, window_bounds = array<i64: 128, 128>}]} {
    %c0 = arith.constant 0 : index
    %c0_0 = arith.constant 0 : index
    %0 = vector.load %arg3[%c0, %c0_0] : memref<128x128xf32, #tpu.memory_space<vmem>>, vector<128x128xf32>
    %c0_1 = arith.constant 0 : index
    %c0_2 = arith.constant 0 : index
    %1 = vector.load %arg4[%c0_1, %c0_2] : memref<128x128xf32, #tpu.memory_space<vmem>>, vector<128x128xf32>
    %cst = arith.constant dense<0.000000e+00> : vector<128x128xf32>
    %2 = tpu.matmul %0, %1, %cst {dimension_numbers = #tpu.dot_dimension_numbers<[1], [1], [0], [0], [0, 0, 1, 0], [], []>} : vector<128x128xf32>, vector<128x128xf32>, vector<128x128xf32> -> vector<128x128xf32>
    %c0_3 = arith.constant 0 : index
    %c0_4 = arith.constant 0 : index
    %3 = vector.load %arg5[%c0_3, %c0_4] : memref<128x1xf32, #tpu.memory_space<vmem>>, vector<128x1xf32>
    %c0_5 = arith.constant 0 : index
    %c0_6 = arith.constant 0 : index
    %4 = vector.load %arg6[%c0_5, %c0_6] : memref<1x128xf32, #tpu.memory_space<vmem>>, vector<1x128xf32>
    %5 = vector.broadcast %3 : vector<128x1xf32> to vector<128x128xf32>
    %6 = vector.broadcast %4 : vector<1x128xf32> to vector<128x128xf32>
    %7 = arith.addf %5, %6 : vector<128x128xf32>
    %cst_7 = arith.constant 2.000000e+00 : f32
    %8 = vector.broadcast %cst_7 : f32 to vector<128x128xf32>
    %9 = arith.mulf %8, %2 : vector<128x128xf32>
    %10 = arith.subf %7, %9 : vector<128x128xf32>
    %cst_8 = arith.constant 0.000000e+00 : f32
    %11 = vector.broadcast %cst_8 : f32 to vector<128x128xf32>
    %12 = arith.maximumf %10, %11 : vector<128x128xf32>
    %c0_9 = arith.constant 0 : index
    %c0_10 = arith.constant 0 : index
    %13 = memref.load %arg2[%c0_9, %c0_10] : memref<1x1xf32, #tpu.memory_space<smem>>
    %14 = vector.broadcast %13 : f32 to vector<128x128xf32>
    %15 = arith.mulf %12, %14 : vector<128x128xf32>
    %16 = math.exp %15 : vector<128x128xf32>
    %c0_11 = arith.constant 0 : index
    %c0_12 = arith.constant 0 : index
    %17 = vector.load %arg7[%c0_11, %c0_12] : memref<128x128xf32, #tpu.memory_space<vmem>>, vector<128x128xf32>
    tpu.vector_store %arg7[%c0_11, %c0_12], %16 {strides = array<i32>} : memref<128x128xf32, #tpu.memory_space<vmem>>, vector<128x128xf32>,
    return
  }
  func.func @transform_0(%arg0: i32, %arg1: i32) -> (i32, i32) {
    %c0_i32 = arith.constant 0 : i32
    %c0_i32_0 = arith.constant 0 : i32
    %c0_i32_1 = arith.constant 0 : i32
    return %c0_i32, %c0_i32_0 : i32, i32
  }
  func.func @transform_1(%arg0: i32, %arg1: i32) -> (i32, i32) {
    %c0_i32 = arith.constant 0 : i32
    %c0_i32_0 = arith.constant 0 : i32
    return %arg0, %c0_i32 : i32, i32
  }
  func.func @transform_2(%arg0: i32, %arg1: i32) -> (i32, i32) {
    %c0_i32 = arith.constant 0 : i32
    %c0_i32_0 = arith.constant 0 : i32
    return %arg1, %c0_i32 : i32, i32
  }
  func.func @transform_3(%arg0: i32, %arg1: i32) -> (i32, i32) {
    %c0_i32 = arith.constant 0 : i32
    %c0_i32_0 = arith.constant 0 : i32
    return %arg0, %c0_i32 : i32, i32
  }
  func.func @transform_4(%arg0: i32, %arg1: i32) -> (i32, i32) {
    %c0_i32 = arith.constant 0 : i32
    %c0_i32_0 = arith.constant 0 : i32
    return %c0_i32, %arg1 : i32, i32
  }
  func.func @transform_5(%arg0: i32, %arg1: i32) -> (i32, i32) {
    %c0_i32 = arith.constant 0 : i32
    return %arg0, %arg1 : i32, i32
  }
}

</mosaic_0001>

<bundles_post_ra>
// kernel: tpu_custom_call.1
= control target key start
LH: loop header
LB: loop body
LE: loop exit
PB: predicated region body
PF: predicated region fallthrough
CT: control target
= control target key end

     0   :  { %11 = vsyncpa [#allocation4], 0  ;;  %s861_s0 = inlined_call_operand.<no memory space> [shape: f32[1,1], index: 0, kind: input, shape index: {}]   ;;  %s862_s1 = inlined_call_operand.vmem [shape: f32[128,128], index: 1, kind: input, shape index: {}]   ;;  %s863_s2 = inlined_call_operand.hbm [shape: f32[128,128], index: 2, kind: input, shape index: {}]   ;;  %s864_s3 = inlined_call_operand.vmem [shape: f32[128,1], index: 3, kind: input, shape index: {}]   ;;  %s865_s4 = inlined_call_operand.vmem [shape: f32[1,128], index: 4, kind: input, shape index: {}]   ;;  %s866_s5 = inlined_call_operand.hbm [shape: f32[128,128], index: 5, kind: output, shape index: {}]  }
   0x1   :  { %12 = vsyncpa [#allocation5], 0  ;;  %s667_s18 = smov [#allocation3]  }
   0x2   :  { %s22_s19 = sshll.u32 %s667_s18, 4  ;;  %s23_s19 = int_to_ptr.vmem [resolvable:$true] %s22_s19 }
   0x3   :  { %s631_s20 = scalar_lea.vmem %s23_s19, 2048  ;;  %p636_p1 = scmp.lt.s32.totalorder %s23_s19, %s23_s19 }
   0x4   :  { %p632_p0 = scmp.ne.s32.totalorder %s23_s19, %s631_s20  ;;  %p637_p2 = scmp.lt.s32.totalorder %s631_s20, %s631_s20 }
   0x6   :  { %p638_p3 = por %p637_p2, %p636_p1 }
   0x8   :  { %p639_p4 = pnand %p638_p3, %p632_p0 }
   0xa   :  { %642 = shalt.err (!%p639_p4)
}
   0xb   :  { %s668_s21 = smov 128   ;;  %s669_s22 = smov 8  }
   0xc   :  { %28 = dma.hbm_to_vmem [thread:$0]  %s863_s2, 2048, %s23_s19, [#allocation4], %s668_s21, %s668_s21, %s669_s22  }
   0xd   :  { %663 = dma.done.wait [#allocation4], 2048  }
   0xe   :  { %664 = vsyncadd [#allocation4], 4294965248  ;;  %v670_v0 = vmov 0   ;;  %v67_v1 = vld [vmem:[#allocation3 + $0x78] sm:$0xff]  ;;  %v66_v2 = vld [vmem:[#allocation3 + $0x70] sm:$0xff] }
   0xf   :  { %590 = vset.pattern.permute.xlu1 %v670_v0  ;;  %589 = vset.pattern.permute.xlu0 %v670_v0  ;;  %v65_v3 = vld [vmem:[#allocation3 + $0x68] sm:$0xff]  ;;  %v36_v4 = vld [vmem:[%s862_s1] sm:$0xff]  ;;  %v215_v7 = vld [vmem:[%s864_s3 + $0x10] sm:$0xff]  ;;  %v810_v0 = vstv %s861_s0  ;;  %s671_s0 = smov [#allocation6]  }
  0x10   :  { %496 = vmatprep.subr.mxu0 %v67_v1  ;;  %552 = vmatprep.subr.mxu1 %v67_v1  ;;  %v44_v5 = vld [vmem:[%s862_s1 + $0x40] sm:$0xff]  ;;  %v63_v9 = vld [vmem:[#allocation3 + $0x58] sm:$0xff]  ;;  %v214_v11 = vld [vmem:[%s864_s3 + $0x8] sm:$0xff] }
  0x11   :  { %497 = vmatpush3.xpose.msra.mxu0 %v67_v1  ;;  %568 = vmatpush3.xpose.msra.mxu1 %v67_v1  ;;  %v64_v6 = vld [vmem:[#allocation3 + $0x60] sm:$0xff]  ;;  %v216_v10 = vld [vmem:[%s864_s3 + $0x18] sm:$0xff]  ;;  %v62_v12 = vld [vmem:[#allocation3 + $0x50] sm:$0xff] }
  0x12   :  { %498 = vmatprep.subr.mxu0 %v66_v2  ;;  %553 = vmatprep.subr.mxu1 %v66_v2  ;;  %v213_v8 = vld [vmem:[%s864_s3] sm:$0xff]  ;;  %v218_v13 = vld [vmem:[%s864_s3 + $0x28] sm:$0xff]  ;;  %v220_v16 = vld [vmem:[%s864_s3 + $0x38] sm:$0xff] }
  0x13   :  { %528 = vmatprep.mubr.f32.mxu0 %v36_v4  ;;  %540 = vmatprep.mubr.f32.mxu1 %v44_v5  ;;  %v217_v14 = vld [vmem:[%s864_s3 + $0x20] sm:$0xff]  ;;  %v61_v15 = vld [vmem:[#allocation3 + $0x48] sm:$0xff]  ;;  %v219_v17 = vld [vmem:[%s864_s3 + $0x30] sm:$0xff] }
  0x14   :  { %242 = vperm.xlu1 %590, %v215_v7   ;;  %232 = vperm.xlu0 %589, %v213_v8   ;;  %v60_v18 = vld [vmem:[#allocation3 + $0x40] sm:$0xff]  ;;  %v222_v19 = vld [vmem:[%s864_s3 + $0x48] sm:$0xff]  ;;  %v59_v21 = vld [vmem:[#allocation3 + $0x38] sm:$0xff] }
  0x15   :  { %499 = vmatpush3.xpose.msra.mxu0 %v66_v2  ;;  %569 = vmatpush3.xpose.msra.mxu1 %v66_v2  ;;  %v221_v20 = vld [vmem:[%s864_s3 + $0x40] sm:$0xff]  ;;  %v224_v22 = vld [vmem:[%s864_s3 + $0x58] sm:$0xff]  ;;  %v223_v23 = vld [vmem:[%s864_s3 + $0x50] sm:$0xff] }
  0x16   :  { %500 = vmatprep.subr.mxu0 %v65_v3  ;;  %554 = vmatprep.subr.mxu1 %v65_v3  ;;  %v58_v24 = vld [vmem:[#allocation3 + $0x30] sm:$0xff]  ;;  %v226_v25 = vld [vmem:[%s864_s3 + $0x68] sm:$0xff]  ;;  %v225_v26 = vld [vmem:[%s864_s3 + $0x60] sm:$0xff] }
  0x17   :  { %v57_v27 = vld [vmem:[#allocation3 + $0x28] sm:$0xff]  ;;  %v228_v28 = vld [vmem:[%s864_s3 + $0x78] sm:$0xff]  ;;  %v227_v29 = vld [vmem:[%s864_s3 + $0x70] sm:$0xff] }
  0x18   :  { %247 = vperm.xlu1 %590, %v216_v10   ;;  %237 = vperm.xlu0 %589, %v214_v11   ;;  %v56_v30 = vld [vmem:[#allocation3 + $0x20] sm:$0xff]  ;;  %v55_v31 = vld [vmem:[#allocation3 + $0x18] sm:$0xff]  ;;  %v54_v32 = vld [vmem:[#allocation3 + $0x10] sm:$0xff] }
  0x19   :  { %501 = vmatpush3.xpose.msra.mxu0 %v65_v3  ;;  %570 = vmatpush3.xpose.msra.mxu1 %v65_v3  ;;  %v53_v33 = vld [vmem:[#allocation3 + $0x8] sm:$0xff]  ;;  %v52_v34 = vld [vmem:[#allocation3] sm:$0xff]  ;;  %v38_v37 = vld [vmem:[%s862_s1 + $0x10] sm:$0xff] }
  0x1a   :  { %502 = vmatprep.subr.mxu0 %v64_v6  ;;  %555 = vmatprep.subr.mxu1 %v64_v6  ;;  %v37_v35 = vld [vmem:[%s862_s1 + $0x8] sm:$0xff]  ;;  %v46_v38 = vld [vmem:[%s862_s1 + $0x50] sm:$0xff]  ;;  %v39_v39 = vld [vmem:[%s862_s1 + $0x18] sm:$0xff] }
  0x1b   :  { %v45_v36 = vld [vmem:[%s862_s1 + $0x48] sm:$0xff]  ;;  %v47_v40 = vld [vmem:[%s862_s1 + $0x58] sm:$0xff]  ;;  %v40_v41 = vld [vmem:[%s862_s1 + $0x20] sm:$0xff] }
  0x1c   :  { %257 = vperm.xlu1 %590, %v218_v13   ;;  %252 = vperm.xlu0 %589, %v217_v14   ;;  %v48_v42 = vld [vmem:[%s862_s1 + $0x60] sm:$0xff]  ;;  %v41_v43 = vld [vmem:[%s862_s1 + $0x28] sm:$0xff]  ;;  %v42_v45 = vld [vmem:[%s862_s1 + $0x30] sm:$0xff] }
  0x1d   :  { %503 = vmatpush3.xpose.msra.mxu0 %v64_v6  ;;  %571 = vmatpush3.xpose.msra.mxu1 %v64_v6  ;;  %v49_v44 = vld [vmem:[%s862_s1 + $0x68] sm:$0xff]  ;;  %v50_v46 = vld [vmem:[%s862_s1 + $0x70] sm:$0xff]  ;;  %v43_v47 = vld [vmem:[%s862_s1 + $0x38] sm:$0xff] }
  0x1e   :  { %504 = vmatprep.subr.mxu0 %v63_v9  ;;  %556 = vmatprep.subr.mxu1 %v63_v9  ;;  %v51_v48 = vld [vmem:[%s862_s1 + $0x78] sm:$0xff]  ;;  %v463_v61 = vld [vmem:[%s865_s4] ss:$0 sm:$0xff]  ;;  %s451_s4 = sshll.u32 %s671_s0, 4  ;;  %s452_s4 = int_to_ptr.vmem [resolvable:$true] %s451_s4 }
  0x1f   :  { %s643_s16 = scalar_lea.vmem %s452_s4, 2048  ;;  %p648_p6 = scmp.lt.s32.totalorder %s452_s4, %s452_s4 }
  0x20   :  { %267 = vperm.xlu1 %590, %v220_v16   ;;  %262 = vperm.xlu0 %589, %v219_v17   ;;  %p644_p5 = scmp.ne.s32.totalorder %s452_s4, %s643_s16  ;;  %p649_p7 = scmp.lt.s32.totalorder %s643_s16, %s643_s16 }
  0x21   :  { %505 = vmatpush3.xpose.msra.mxu0 %v63_v9  ;;  %572 = vmatpush3.xpose.msra.mxu1 %v63_v9 }
  0x22   :  { %506 = vmatprep.subr.mxu0 %v62_v12  ;;  %557 = vmatprep.subr.mxu1 %v62_v12  ;;  %p650_p8 = por %p649_p7, %p648_p6 }
  0x24   :  { %277 = vperm.xlu1 %590, %v222_v19   ;;  %272 = vperm.xlu0 %589, %v221_v20   ;;  %p651_p9 = pnand %p650_p8, %p644_p5 }
  0x25   :  { %507 = vmatpush3.xpose.msra.mxu0 %v62_v12  ;;  %573 = vmatpush3.xpose.msra.mxu1 %v62_v12 }
  0x26   :  { %508 = vmatprep.subr.mxu0 %v61_v15  ;;  %558 = vmatprep.subr.mxu1 %v61_v15 }
  0x28   :  { %287 = vperm.xlu1 %590, %v224_v22   ;;  %282 = vperm.xlu0 %589, %v223_v23  }
  0x29   :  { %509 = vmatpush3.xpose.msra.mxu0 %v61_v15  ;;  %574 = vmatpush3.xpose.msra.mxu1 %v61_v15 }
  0x2a   :  { %510 = vmatprep.subr.mxu0 %v60_v18  ;;  %559 = vmatprep.subr.mxu1 %v60_v18 }
  0x2c   :  { %297 = vperm.xlu1 %590, %v226_v25   ;;  %292 = vperm.xlu0 %589, %v225_v26  }
  0x2d   :  { %511 = vmatpush3.xpose.msra.mxu0 %v60_v18  ;;  %575 = vmatpush3.xpose.msra.mxu1 %v60_v18 }
  0x2e   :  { %512 = vmatprep.subr.mxu0 %v59_v21  ;;  %560 = vmatprep.subr.mxu1 %v59_v21 }
  0x30   :  { %307 = vperm.xlu1 %590, %v228_v28   ;;  %302 = vperm.xlu0 %589, %v227_v29  }
  0x31   :  { %513 = vmatpush3.xpose.msra.mxu0 %v59_v21  ;;  %576 = vmatpush3.xpose.msra.mxu1 %v59_v21 }
  0x32   :  { %514 = vmatprep.subr.mxu0 %v58_v24  ;;  %561 = vmatprep.subr.mxu1 %v58_v24 }
  0x35   :  { %515 = vmatpush3.xpose.msra.mxu0 %v58_v24  ;;  %577 = vmatpush3.xpose.msra.mxu1 %v58_v24 }
  0x36   :  { %516 = vmatprep.subr.mxu0 %v57_v27  ;;  %562 = vmatprep.subr.mxu1 %v57_v27 }
  0x39   :  { %517 = vmatpush3.xpose.msra.mxu0 %v57_v27  ;;  %578 = vmatpush3.xpose.msra.mxu1 %v57_v27 }
  0x3a   :  { %518 = vmatprep.subr.mxu0 %v56_v30  ;;  %563 = vmatprep.subr.mxu1 %v56_v30 }
  0x3d   :  { %519 = vmatpush3.xpose.msra.mxu0 %v56_v30  ;;  %579 = vmatpush3.xpose.msra.mxu1 %v56_v30 }
  0x3e   :  { %520 = vmatprep.subr.mxu0 %v55_v31  ;;  %564 = vmatprep.subr.mxu1 %v55_v31 }
  0x41   :  { %521 = vmatpush3.xpose.msra.mxu0 %v55_v31  ;;  %580 = vmatpush3.xpose.msra.mxu1 %v55_v31 }
  0x42   :  { %522 = vmatprep.subr.mxu0 %v54_v32  ;;  %565 = vmatprep.subr.mxu1 %v54_v32 }
  0x45   :  { %523 = vmatpush3.xpose.msra.mxu0 %v54_v32  ;;  %581 = vmatpush3.xpose.msra.mxu1 %v54_v32 }
  0x46   :  { %524 = vmatprep.subr.mxu0 %v53_v33  ;;  %566 = vmatprep.subr.mxu1 %v53_v33 }
  0x49   :  { %525 = vmatpush3.xpose.msra.mxu0 %v53_v33  ;;  %582 = vmatpush3.xpose.msra.mxu1 %v53_v33 }
  0x4a   :  { %526 = vmatprep.subr.mxu0 %v52_v34  ;;  %567 = vmatprep.subr.mxu1 %v52_v34 }
  0x4d   :  { %527 = vmatpush3.xpose.msra.mxu0 %v52_v34  ;;  %583 = vmatpush3.xpose.msra.mxu1 %v52_v34 }
  0x50   :  { %529 = vmatmul.mubr.f32.vlgmr.msra.gmra.mxu0 %v37_v35  ;;  %541 = vmatmul.mubr.f32.vlgmr.msra.gmra.mxu1 %v45_v36 }
  0x51   :  { %531 = vmatprep.mubr.f32.mxu0 %v38_v37  ;;  %543 = vmatprep.mubr.f32.mxu1 %v46_v38 }
  0x54   :  { %532 = vmatmul.mubr.f32.gmra.mxu0 %v39_v39  ;;  %544 = vmatmul.mubr.f32.gmra.mxu1 %v47_v40 }
  0x55   :  { %534 = vmatprep.mubr.f32.mxu0 %v40_v41  ;;  %546 = vmatprep.mubr.f32.mxu1 %v48_v42 }
  0x58   :  { %535 = vmatmul.mubr.f32.gmra.mxu0 %v41_v43  ;;  %547 = vmatmul.mubr.f32.gmra.mxu1 %v49_v44 }
  0x59   :  { %537 = vmatprep.mubr.f32.mxu0 %v42_v45  ;;  %549 = vmatprep.mubr.f32.mxu1 %v50_v46 }
  0x5c   :  { %538 = vmatmul.mubr.f32.gmra.mxu0 %v43_v47  ;;  %550 = vmatmul.mubr.f32.gmra.mxu1 %v51_v48 }
  0x8f   :  { %v243_v49 = vpop.permute.xlu1 %242  ;;  %v233_v50 = vpop.permute.xlu0 %232 }
  0x90   :  { %v812_v1 = vadd.f32 %v463_v61, %v243_v49  ;;  %v316_v2 = vadd.f32 %v463_v61, %v233_v50 }
  0x93   :  { %v248_v51 = vpop.permute.xlu1 %247  ;;  %v238_v52 = vpop.permute.xlu0 %237 }
  0x94   :  { %v319_v3 = vadd.f32 %v463_v61, %v248_v51  ;;  %v317_v4 = vadd.f32 %v463_v61, %v238_v52 }
  0x97   :  { %v258_v53 = vpop.permute.xlu1 %257  ;;  %v253_v54 = vpop.permute.xlu0 %252 }
  0x98   :  { %v814_v7 = vadd.f32 %v463_v61, %v258_v53  ;;  %v816_v11 = vadd.f32 %v463_v61, %v253_v54 }
  0x9b   :  { %v268_v55 = vpop.permute.xlu1 %267  ;;  %v263_v56 = vpop.permute.xlu0 %262 }
  0x9c   :  { %v818_v12 = vadd.f32 %v463_v61, %v268_v55  ;;  %v820_v13 = vadd.f32 %v463_v61, %v263_v56 }
  0x9f   :  { %v278_v57 = vpop.permute.xlu1 %277  ;;  %v273_v58 = vpop.permute.xlu0 %272 }
  0xa0   :  { %v325_v8 = vadd.f32 %v463_v61, %v278_v57  ;;  %v324_v14 = vadd.f32 %v463_v61, %v273_v58 }
  0xa3   :  { %v288_v59 = vpop.permute.xlu1 %287  ;;  %v283_v60 = vpop.permute.xlu0 %282 }
  0xa4   :  { %v327_v23 = vadd.f32 %v463_v61, %v288_v59  ;;  %v326_v24 = vadd.f32 %v463_v61, %v283_v60 }
  0xa7   :  { %v298_v62 = vpop.permute.xlu1 %297  ;;  %v293_v63 = vpop.permute.xlu0 %292 }
  0xa8   :  { %v822_v25 = vadd.f32 %v463_v61, %v298_v62  ;;  %v824_v26 = vadd.f32 %v463_v61, %v293_v63 }
  0xab   :  { %v308_v17 = vpop.permute.xlu1 %307  ;;  %v303_v18 = vpop.permute.xlu0 %302 }
  0xac   :  { %v826_v33 = vadd.f32 %v463_v61, %v308_v17  ;;  %v828_v34 = vadd.f32 %v463_v61, %v303_v18 }
 0x110   :  { %v530_v5 = vpop.f32.mrf.mxu0  ;;  %v542_v6 = vpop.f32.mrf.mxu1 }
 0x111   :  { %v333_v9 = vmul.f32 2.0, %v530_v5  ;;  %v341_v10 = vmul.f32 2.0, %v542_v6 }
 0x112   :  { %v134_v15 = vpop.f32.mrf.mxu0  ;;  %v174_v16 = vpop.f32.mrf.mxu1 }
 0x113   :  { %v349_v19 = vsub.f32 %v317_v4, %v333_v9  ;;  %v357_v20 = vsub.f32 %v325_v8, %v341_v10  ;;  %v332_v21 = vmul.f32 2.0, %v134_v15  ;;  %v340_v22 = vmul.f32 2.0, %v174_v16 }
 0x114   :  { %v533_v27 = vpop.f32.mrf.mxu0  ;;  %v545_v28 = vpop.f32.mrf.mxu1 }
 0x115   :  { %v365_v29 = vmax.f32 %v349_v19, 0.0  ;;  %v373_v30 = vmax.f32 %v357_v20, 0.0  ;;  %v348_v31 = vsub.f32 %v316_v2, %v332_v21  ;;  %v356_v32 = vsub.f32 %v324_v14, %v340_v22 }
 0x116   :  { %v335_v35 = vmul.f32 2.0, %v533_v27  ;;  %v343_v36 = vmul.f32 2.0, %v545_v28  ;;  %v144_v37 = vpop.f32.mrf.mxu0  ;;  %v184_v38 = vpop.f32.mrf.mxu1 }
 0x117   :  { %v383_v39 = vmul.f32 %v810_v0, %v365_v29  ;;  %v391_v40 = vmul.f32 %v810_v0, %v373_v30  ;;  %v364_v41 = vmax.f32 %v348_v31, 0.0  ;;  %v372_v42 = vmax.f32 %v356_v32, 0.0 }
 0x118   :  { %v351_v43 = vsub.f32 %v319_v3, %v335_v35  ;;  %v359_v44 = vsub.f32 %v327_v23, %v343_v36  ;;  %v334_v45 = vmul.f32 2.0, %v144_v37  ;;  %v342_v46 = vmul.f32 2.0, %v184_v38  ;;  %v536_v47 = vpop.f32.mrf.mxu0  ;;  %v548_v48 = vpop.f32.mrf.mxu1 }
 0x119   :  { %v400_v49 = vmul.f32 1.442695, %v383_v39  ;;  %v416_v50 = vmul.f32 1.442695, %v391_v40  ;;  %v382_v51 = vmul.f32 %v810_v0, %v364_v41  ;;  %v390_v52 = vmul.f32 %v810_v0, %v372_v42 }
 0x11a   :  { %v367_v53 = vmax.f32 %v351_v43, 0.0  ;;  %v375_v54 = vmax.f32 %v359_v44, 0.0  ;;  %v350_v55 = vsub.f32 %v812_v1, %v334_v45  ;;  %v358_v56 = vsub.f32 %v326_v24, %v342_v46  ;;  %v154_v57 = vpop.f32.mrf.mxu0  ;;  %v194_v58 = vpop.f32.mrf.mxu1 }
 0x11b   :  { %591 = vpow2.f32 %v400_v49  ;;  %v398_v59 = vmul.f32 1.442695, %v382_v51  ;;  %v414_v60 = vmul.f32 1.442695, %v390_v52  ;;  %v337_v61 = vmul.f32 2.0, %v536_v47 }
 0x11c   :  { %593 = vpow2.f32 %v416_v50  ;;  %v385_v62 = vmul.f32 %v810_v0, %v367_v53  ;;  %v393_v63 = vmul.f32 %v810_v0, %v375_v54  ;;  %v366_v2 = vmax.f32 %v350_v55, 0.0  ;;  %v539_v6 = vpop.f32.mrf.mxu0  ;;  %v551_v10 = vpop.f32.mrf.mxu1 }
 0x11d   :  { %595 = vpow2.f32 %v398_v59  ;;  %v374_v3 = vmax.f32 %v358_v56, 0.0  ;;  %v353_v4 = vsub.f32 %v814_v7, %v337_v61  ;;  %v345_v5 = vmul.f32 2.0, %v548_v48 }
 0x11e   :  { %597 = vpow2.f32 %v414_v60  ;;  %v404_v1 = vmul.f32 1.442695, %v385_v62  ;;  %v420_v8 = vmul.f32 1.442695, %v393_v63  ;;  %v384_v9 = vmul.f32 %v810_v0, %v366_v2  ;;  %v164_v23 = vpop.f32.mrf.mxu0  ;;  %v204_v29 = vpop.f32.mrf.mxu1 }
 0x11f   :  { %v392_v14 = vmul.f32 %v810_v0, %v374_v3  ;;  %v369_v15 = vmax.f32 %v353_v4, 0.0  ;;  %v361_v16 = vsub.f32 %v822_v25, %v345_v5  ;;  %v336_v17 = vmul.f32 2.0, %v154_v57 }
 0x120   :  { %599 = vpow2.f32 %v404_v1  ;;  %v402_v18 = vmul.f32 1.442695, %v384_v9  ;;  %v344_v19 = vmul.f32 2.0, %v194_v58  ;;  %v339_v20 = vmul.f32 2.0, %v539_v6 }
 0x121   :  { %601 = vpow2.f32 %v420_v8  ;;  %v418_v7 = vmul.f32 1.442695, %v392_v14  ;;  %v387_v21 = vmul.f32 %v810_v0, %v369_v15  ;;  %v377_v22 = vmax.f32 %v361_v16, 0.0 }
 0x122   :  { %603 = vpow2.f32 %v402_v18  ;;  %v352_v24 = vsub.f32 %v816_v11, %v336_v17  ;;  %v360_v27 = vsub.f32 %v824_v26, %v344_v19  ;;  %v355_v28 = vsub.f32 %v818_v12, %v339_v20 }
 0x123   :  { %605 = vpow2.f32 %v418_v7  ;;  %v408_v25 = vmul.f32 1.442695, %v387_v21  ;;  %v395_v30 = vmul.f32 %v810_v0, %v377_v22  ;;  %v347_v31 = vmul.f32 2.0, %v551_v10 }
 0x124   :  { %v368_v32 = vmax.f32 %v352_v24, 0.0  ;;  %v376_v35 = vmax.f32 %v360_v27, 0.0  ;;  %v371_v36 = vmax.f32 %v355_v28, 0.0  ;;  %v338_v37 = vmul.f32 2.0, %v164_v23 }
 0x125   :  { %607 = vpow2.f32 %v408_v25  ;;  %v424_v38 = vmul.f32 1.442695, %v395_v30  ;;  %v363_v39 = vsub.f32 %v826_v33, %v347_v31  ;;  %v346_v40 = vmul.f32 2.0, %v204_v29 }
 0x126   :  { %v386_v11 = vmul.f32 %v810_v0, %v368_v32  ;;  %v394_v26 = vmul.f32 %v810_v0, %v376_v35  ;;  %v389_v12 = vmul.f32 %v810_v0, %v371_v36  ;;  %v354_v41 = vsub.f32 %v820_v13, %v338_v37 }
 0x127   :  { %609 = vpow2.f32 %v424_v38  ;;  %v379_v42 = vmax.f32 %v363_v39, 0.0  ;;  %v362_v43 = vsub.f32 %v828_v34, %v346_v40 }
 0x128   :  { %v592_v44 = vpop.eup %591  ;;  %v406_v45 = vmul.f32 1.442695, %v386_v11  ;;  %v422_v46 = vmul.f32 1.442695, %v394_v26  ;;  %v412_v47 = vmul.f32 1.442695, %v389_v12 }
 0x129   :  { %v594_v48 = vpop.eup %593  ;;  %431 = vst [vmem:[#allocation6 + $0x8] sm:$0xff] %v592_v44  ;;  %v397_v33 = vmul.f32 %v810_v0, %v379_v42  ;;  %v370_v49 = vmax.f32 %v354_v41, 0.0  ;;  %v378_v50 = vmax.f32 %v362_v43, 0.0 }
 0x12a   :  { %v596_v51 = vpop.eup %595  ;;  %439 = vst [vmem:[#allocation6 + $0x48] sm:$0xff] %v594_v48  ;;  %611 = vpow2.f32 %v406_v45 }
 0x12b   :  { %v598_v52 = vpop.eup %597  ;;  %430 = vst [vmem:[#allocation6] sm:$0xff] %v596_v51  ;;  %613 = vpow2.f32 %v422_v46  ;;  %v428_v13 = vmul.f32 1.442695, %v397_v33  ;;  %v388_v53 = vmul.f32 %v810_v0, %v370_v49  ;;  %v396_v34 = vmul.f32 %v810_v0, %v378_v50 }
 0x12c   :  { %438 = vst [vmem:[#allocation6 + $0x40] sm:$0xff] %v598_v52  ;;  %615 = vpow2.f32 %v412_v47 }
 0x12d   :  { %v600_v54 = vpop.eup %599  ;;  %617 = vpow2.f32 %v428_v13  ;;  %v410_v55 = vmul.f32 1.442695, %v388_v53  ;;  %v426_v56 = vmul.f32 1.442695, %v396_v34 }
 0x12e   :  { %v602_v57 = vpop.eup %601  ;;  %433 = vst [vmem:[#allocation6 + $0x18] sm:$0xff] %v600_v54 }
 0x12f   :  { %v604_v58 = vpop.eup %603  ;;  %441 = vst [vmem:[#allocation6 + $0x58] sm:$0xff] %v602_v57  ;;  %619 = vpow2.f32 %v410_v55 }
 0x130   :  { %v606_v59 = vpop.eup %605  ;;  %432 = vst [vmem:[#allocation6 + $0x10] sm:$0xff] %v604_v58  ;;  %621 = vpow2.f32 %v426_v56 }
 0x131   :  { %440 = vst [vmem:[#allocation6 + $0x50] sm:$0xff] %v606_v59 }
 0x132   :  { %v608_v60 = vpop.eup %607 }
 0x133   :  { %435 = vst [vmem:[#allocation6 + $0x28] sm:$0xff] %v608_v60 }
 0x134   :  { %v610_v61 = vpop.eup %609 }
 0x135   :  { %443 = vst [vmem:[#allocation6 + $0x68] sm:$0xff] %v610_v61 }
 0x137   :  { %v612_v0 = vpop.eup %611 }
 0x138   :  { %v614_v62 = vpop.eup %613  ;;  %434 = vst [vmem:[#allocation6 + $0x20] sm:$0xff] %v612_v0 }
 0x139   :  { %v616_v63 = vpop.eup %615  ;;  %442 = vst [vmem:[#allocation6 + $0x60] sm:$0xff] %v614_v62 }
 0x13a   :  { %v618_v2 = vpop.eup %617  ;;  %437 = vst [vmem:[#allocation6 + $0x38] sm:$0xff] %v616_v63 }
 0x13b   :  { %445 = vst [vmem:[#allocation6 + $0x78] sm:$0xff] %v618_v2 }
 0x13c   :  { %v620_v3 = vpop.eup %619 }
 0x13d   :  { %v622_v4 = vpop.eup %621  ;;  %436 = vst [vmem:[#allocation6 + $0x30] sm:$0xff] %v620_v3 }
 0x13e   :  { %444 = vst [vmem:[#allocation6 + $0x70] sm:$0xff] %v622_v4 }
 0x13f   :  { %654 = shalt.err (!%p651_p9)
}
 0x140   :  { %457 = dma.vmem_to_hbm [thread:$0]  %s452_s4, 2048, %s866_s5, [#allocation5], %s668_s21, %s668_s21, %s669_s22  }
 0x141   :  { %665 = dma.done.wait [#allocation5], 2048  }
 0x142   :  { %666 = vsyncadd [#allocation5], 4294965248 }
 0x143   :  { %461 = vsyncpa [#allocation4], 1 }
 0x144   :  { %462 = vsyncpa [#allocation5], 1 }

</bundles_post_ra>
